<compile_context>
chip_gen: v7x
topology: tpu7x:2x2x1
jax: 0.10.0
libtpu: 0.0.40
codegen_flags: <defaults>
</compile_context>

<pallas_src>
import functools
import math

import jax
import jax.numpy as jnp
import numpy as np
from jax import lax
from jax.experimental import pallas as pl
from jax.experimental.pallas import tpu as pltpu


def _round_up(n, m):
    return ((n + m - 1) // m) * m


# --------------------------------------------------------------------------- #
# Parameter fusion (done once, at init time)
# --------------------------------------------------------------------------- #
def fuse_attention_params(wq, bq, wk, bk, wv, bv, *, key_size, param_dtype=None):
    """Build the fused projection weight/bias once.

    Lane layout of the fused matrices (width W = qk_pad + v_pad):
        [ Wq * 1/sqrt(key_size) | Wk | zeros ][ Wv | zeros ]
          <------- qk_pad = roundup(2K,128) --><-- v_pad = roundup(V,128) -->

    Folding 1/sqrt(key_size) into Wq/bq removes a per-step VPU multiply in the
    kernel; the V section gets its own lane-aligned 128-multiple block so the
    kernel's output stores are lane-dense.
    """
    C, K = wq.shape
    V = wv.shape[1]
    inv = 1.0 / math.sqrt(key_size)
    qk_pad = _round_up(2 * K, 128)
    v_pad = _round_up(V, 128)
    if param_dtype is None:
        param_dtype = wq.dtype

    def pad_cols(a, width):
        return jnp.pad(a, ((0, 0), (0, width - a.shape[1])))

    wqk = pad_cols(jnp.concatenate([wq * inv, wk], axis=1), qk_pad)
    bqk = pad_cols(jnp.concatenate([bq * inv, bk], axis=1), qk_pad)
    wqkv = jnp.concatenate([wqk, pad_cols(wv, v_pad)], axis=1).astype(param_dtype)
    bqkv = jnp.concatenate([bqk, pad_cols(bv, v_pad)], axis=1).astype(param_dtype)
    meta = dict(key_size=K, value_size=V, qk_pad=qk_pad, v_pad=v_pad)
    return wqkv, bqkv, meta


# --------------------------------------------------------------------------- #
# Kernel
# --------------------------------------------------------------------------- #
def attention_block_kernel(x_ref, wqkv_ref, bqkv_ref, o_ref, qkv_scr, *,
                           seq_len, key_size, qk_pad):
    """One grid step: block_b folded batches.

    x_ref    : (block_b*T, C)
    wqkv_ref : (C, W)        fused [Wq*s | Wk | pad][Wv | pad]
    bqkv_ref : (1, W)
    o_ref    : (block_b*T, Vpad)   attention slab only (lane-dense)
    qkv_scr  : VMEM (block_b*T, W) f32 scratch holding the fused projection
    """
    t = seq_len
    rows, _ = x_ref.shape
    bb = rows // t
    out_dtype = o_ref.dtype

    # Fused Q/K/V projection: one big-M MXU matmul, f32 accumulation.  The
    # 1/sqrt(key_size) scale is already folded into the Q weights/bias.
    qkv = jnp.dot(x_ref[...], wqkv_ref[...], preferred_element_type=jnp.float32)
    qkv_scr[...] = qkv + bqkv_ref[...].astype(jnp.float32)

    # Causal "future" mask (key > query), built ONCE per grid step.  In the
    # transposed (key-major) score layout: sublanes = key index, lanes = query.
    key_idx = lax.broadcasted_iota(jnp.int32, (t, t), 0)
    qry_idx = lax.broadcasted_iota(jnp.int32, (t, t), 1)
    future = key_idx > qry_idx

    def body(b, carry):
        row = pl.multiple_of(b * t, t)
        qkv_b = qkv_scr[pl.ds(row, t), :]                 # (T, W) f32
        q = qkv_b[:, :key_size]                           # (T, K), pre-scaled
        k = qkv_b[:, key_size:2 * key_size]               # (T, K)
        v = qkv_b[:, qk_pad:]                             # (T, Vpad), lane-aligned

        # Transposed scores s_t[key, query] so the torch dim=1 (query-axis)
        # softmax reduces along the lane axis.
        s_t = lax.dot_general(k, q, (((1,), (1,)), ((), ())),
                              preferred_element_type=jnp.float32)      # (T, T)
        s_t = jnp.where(future, -jnp.inf, s_t)

        m = jnp.max(s_t, axis=-1, keepdims=True)
        e = jnp.exp(s_t - m)
        denom = jnp.sum(e, axis=-1, keepdims=True)
        p_t = e * pl.reciprocal(denom, approx=True)        # EUP reciprocal

        # attn[q, :] = sum_k p_t[k, q] * v[k, :] -- contract dim 0 of p_t
        # directly (no explicit XLU transpose of the (T, T) probabilities).
        attn = lax.dot_general(p_t, v, (((0,), (0,)), ((), ())),
                               preferred_element_type=jnp.float32)     # (T, Vpad)

        # Lane-dense, unmasked store of the whole (T, Vpad) slab.
        o_ref[pl.ds(row, t), :] = attn.astype(out_dtype)
        return carry

    lax.fori_loop(0, bb, body, 0, unroll=min(2, bb))


# --------------------------------------------------------------------------- #
# Generation-aware tiling
# --------------------------------------------------------------------------- #
def _tpu_defaults():
    """(target rows of M per grid step, scoped-VMEM budget bytes) by generation."""
    try:
        kind = jax.devices()[0].device_kind.lower()
    except Exception:
        kind = ""
    if "v5" in kind and "v5p" not in kind:
        # v5e: 4x128^2 MXU, single vst slot, 16 MiB default scoped VMEM.
        return 256, 32 * 1024 * 1024
    if "v6" in kind:
        # v6e: 2x256^2 MXU, 128 MiB physical VMEM -> bigger blocks, higher limit.
        return 1024, 64 * 1024 * 1024
    # v7x (64 MiB physical VMEM) and anything unknown: stay conservative.
    return 512, 32 * 1024 * 1024


def _choose_block_b(batch, seq_len, in_ch, v_pad, fused_w, itemsize,
                    target_rows, vmem_budget):
    """Largest batch fold whose VMEM footprint fits the budget, whose M stays
    near the MXU target, and that keeps >= 2 grid steps when the batch allows
    (so both v7x TensorCores / the pipeline get work)."""
    def footprint(bb):
        rows = bb * seq_len
        return (2 * rows * in_ch * itemsize            # x block (double-buffered)
                + 2 * rows * v_pad * itemsize          # out block (double-buffered)
                + 2 * (in_ch + 1) * fused_w * itemsize # fused weights + bias
                + 2 * rows * fused_w * 4               # f32 qkv scratch + live value
                + 8 * seq_len * seq_len * 4)           # score/softmax temporaries
    divisors = [d for d in range(1, batch + 1) if batch % d == 0]
    fits = [d for d in divisors if footprint(d) <= (vmem_budget * 3) // 4] or [1]
    cands = [d for d in fits if d * seq_len <= target_rows] or [min(fits)]
    multi = [d for d in cands if batch // d >= 2]
    return max(multi or cands)


# --------------------------------------------------------------------------- #
# Wrapper (forward pass)
# --------------------------------------------------------------------------- #
def attention_block(x, wqkv, bqkv, meta, *, block_b=None):
    """x: (B, T, C); wqkv/bqkv/meta from fuse_attention_params (built at init)."""
    B, T, C = x.shape
    K, V = meta["key_size"], meta["value_size"]
    qk_pad, v_pad = meta["qk_pad"], meta["v_pad"]
    W = qk_pad + v_pad
    assert wqkv.shape == (C, W) and bqkv.shape == (1, W)

    # Consistent matmul dtype: follow the fused-weight dtype (store params in
    # bf16 for the full-rate MXU path; the demo keeps f32 for exactness).
    compute_dtype = wqkv.dtype
    x2d = x.reshape(B * T, C).astype(compute_dtype)

    target_rows, vmem_budget = _tpu_defaults()
    if block_b is None:
        block_b = _choose_block_b(B, T, C, v_pad, W,
                                  jnp.dtype(compute_dtype).itemsize,
                                  target_rows, vmem_budget)
    assert B % block_b == 0, "block_b must divide the batch size"
    rows = block_b * T
    grid = (B // block_b,)

    kernel = functools.partial(attention_block_kernel,
                               seq_len=T, key_size=K, qk_pad=qk_pad)

    attn2d = pl.pallas_call(
        kernel,
        out_shape=jax.ShapeDtypeStruct((B * T, v_pad), compute_dtype),
        grid_spec=pltpu.PrefetchScalarGridSpec(
            num_scalar_prefetch=0,
            grid=grid,
            in_specs=[
                pl.BlockSpec((rows, C), lambda b: (b, 0)),   # x, block_b batches
                pl.BlockSpec((C, W), lambda b: (0, 0)),      # fused Wqkv (constant)
                pl.BlockSpec((1, W), lambda b: (0, 0)),      # fused bias (constant)
            ],
            out_specs=pl.BlockSpec((rows, v_pad), lambda b: (b, 0)),
            scratch_shapes=[pltpu.VMEM((rows, W), jnp.float32)],
        ),
        compiler_params=pltpu.CompilerParams(
            dimension_semantics=("parallel",),
            vmem_limit_bytes=vmem_budget,
        ),
    )(x2d, wqkv, bqkv)

    # Lane-dense kernel output; slice the zero-padded V columns and concat with
    # x in plain XLA (cheap, outside the kernel).
    attn = attn2d.reshape(B, T, v_pad)[:, :, :V].astype(x.dtype)
    return jnp.concatenate([x, attn], axis=2)


# --------------------------------------------------------------------------- #
# Pure-JAX reference (mirrors the PyTorch forward exactly)
# --------------------------------------------------------------------------- #
def reference(x, wq, bq, wk, bk, wv, bv, *, key_size):
    q = x @ wq + bq
    k = x @ wk + bk
    v = x @ wv + bv
    s = jnp.einsum("bqd,bkd->bqk", q, k)
    T = x.shape[1]
    mask = (jnp.arange(T)[None, :] > jnp.arange(T)[:, None])[None]  # key > query
    s = jnp.where(mask, -jnp.inf, s)
    p = jax.nn.softmax(s / math.sqrt(key_size), axis=1)             # dim=1 (!)
    attn = jnp.einsum("bqk,bkv->bqv", p, v)
    return jnp.concatenate([x, attn], axis=2)


if __name__ == "__main__":
    B, T, C = 2, 8, 32          # batch, seq_len, in_channels
    key_size, value_size = 16, 16

    root = jax.random.PRNGKey(0)
    kx, k1, k2, k3, k4, k5, k6 = jax.random.split(root, 7)

    x = jax.random.normal(kx, (B, T, C), dtype=jnp.float32)

    # PyTorch nn.Linear-style uniform init, stored already transposed to
    # (in, out) so the kernel computes x @ W.
    bound = 1.0 / math.sqrt(C)
    wq = jax.random.uniform(k1, (C, key_size), jnp.float32, -bound, bound)
    bq = jax.random.uniform(k2, (1, key_size), jnp.float32, -bound, bound)
    wk = jax.random.uniform(k3, (C, key_size), jnp.float32, -bound, bound)
    bk = jax.random.uniform(k4, (1, key_size), jnp.float32, -bound, bound)
    wv = jax.random.uniform(k5, (C, value_size), jnp.float32, -bound, bound)
    bv = jax.random.uniform(k6, (1, value_size), jnp.float32, -bound, bound)

    # Fuse / pad / scale-fold the projection params ONCE ("init time").
    wqkv, bqkv, meta = fuse_attention_params(wq, bq, wk, bk, wv, bv,
                                             key_size=key_size)

    out = attention_block(x, wqkv, bqkv, meta)
    out = jax.block_until_ready(out)

    ref = reference(x, wq, bq, wk, bk, wv, bv, key_size=key_size)
    # Slightly loose tolerance: pl.reciprocal(approx=True) in the softmax
    # denominator introduces ~1e-3-level relative error vs. exact division.
    np.testing.assert_allclose(np.asarray(out), np.asarray(ref),
                               rtol=1e-2, atol=1e-2)

    assert out.shape == (B, T, C + value_size)
    print("KERNEL_OK")
</pallas_src>

<mosaic_0001>
module attributes {stable_mosaic.version = 11 : i64} {
  func.func @attention_block_kernel(%arg0: i32, %arg1: memref<8x32xf32, #tpu.memory_space<vmem>>, %arg2: memref<32x256xf32, #tpu.memory_space<vmem>>, %arg3: memref<1x256xf32, #tpu.memory_space<vmem>>, %arg4: memref<8x128xf32, #tpu.memory_space<vmem>>, %arg5: memref<8x256xf32, #tpu.memory_space<vmem>>) attributes {dimension_semantics = [#tpu.dimension_semantics<parallel>], iteration_bounds = array<i64: 2>, scalar_prefetch = 0 : i64, scratch_operands = 1 : i64, tpu.core_type = #tpu.core_type<tc>, window_params = [{transform_indices = @transform_0, window_bounds = array<i64: 8, 32>}, {pipeline_mode = #tpu.pipeline_mode<synchronous>, transform_indices = @transform_1, window_bounds = array<i64: 32, 256>}, {pipeline_mode = #tpu.pipeline_mode<synchronous>, transform_indices = @transform_2, window_bounds = array<i64: 1, 256>}, {transform_indices = @transform_3, window_bounds = array<i64: 8, 128>}]} {
    %c0 = arith.constant 0 : index
    %c0_0 = arith.constant 0 : index
    %0 = vector.load %arg1[%c0, %c0_0] : memref<8x32xf32, #tpu.memory_space<vmem>>, vector<8x32xf32>
    %c0_1 = arith.constant 0 : index
    %c0_2 = arith.constant 0 : index
    %1 = vector.load %arg2[%c0_1, %c0_2] : memref<32x256xf32, #tpu.memory_space<vmem>>, vector<32x256xf32>
    %cst = arith.constant dense<0.000000e+00> : vector<8x256xf32>
    %2 = tpu.matmul %0, %1, %cst {dimension_numbers = #tpu.dot_dimension_numbers<[1], [0], [0], [1], [0, 0, 1, 1], [], []>} : vector<8x32xf32>, vector<32x256xf32>, vector<8x256xf32> -> vector<8x256xf32>
    %c0_3 = arith.constant 0 : index
    %c0_4 = arith.constant 0 : index
    %3 = vector.load %arg3[%c0_3, %c0_4] : memref<1x256xf32, #tpu.memory_space<vmem>>, vector<1x256xf32>
    %4 = vector.broadcast %3 : vector<1x256xf32> to vector<8x256xf32>
    %5 = arith.addf %2, %4 : vector<8x256xf32>
    %c0_5 = arith.constant 0 : index
    %c0_6 = arith.constant 0 : index
    %6 = vector.load %arg5[%c0_5, %c0_6] : memref<8x256xf32, #tpu.memory_space<vmem>>, vector<8x256xf32>
    tpu.vector_store %arg5[%c0_5, %c0_6], %5 {strides = array<i32>} : memref<8x256xf32, #tpu.memory_space<vmem>>, vector<8x256xf32>,
    %7 = tpu.iota {dimensions = array<i32: 0>} : vector<8x8xi32>
    %8 = tpu.iota {dimensions = array<i32: 1>} : vector<8x8xi32>
    %9 = arith.cmpi sgt, %7, %8 : vector<8x8xi32>
    %c0_i32 = arith.constant 0 : i32
    %c8_i32 = arith.constant 8 : i32
    %10 = arith.muli %c0_i32, %c8_i32 : i32
    %11 = tpu.assume_multiple %10, 8 : i32
    %12 = arith.index_cast %11 : i32 to index
    %c0_7 = arith.constant 0 : index
    %13 = vector.load %arg5[%12, %c0_7] : memref<8x256xf32, #tpu.memory_space<vmem>>, vector<8x256xf32>
    %14 = vector.extract_strided_slice %13 {offsets = [0, 0], sizes = [8, 16], strides = [1, 1]} : vector<8x256xf32> to vector<8x16xf32>
    %15 = vector.extract_strided_slice %13 {offsets = [0, 16], sizes = [8, 16], strides = [1, 1]} : vector<8x256xf32> to vector<8x16xf32>
    %16 = vector.extract_strided_slice %13 {offsets = [0, 128], sizes = [8, 128], strides = [1, 1]} : vector<8x256xf32> to vector<8x128xf32>
    %cst_8 = arith.constant dense<0.000000e+00> : vector<8x8xf32>
    %17 = tpu.matmul %15, %14, %cst_8 {dimension_numbers = #tpu.dot_dimension_numbers<[1], [1], [0], [0], [0, 0, 1, 0], [], []>} : vector<8x16xf32>, vector<8x16xf32>, vector<8x8xf32> -> vector<8x8xf32>
    %cst_9 = arith.constant 0xFF800000 : f32
    %18 = vector.broadcast %cst_9 : f32 to vector<8x8xf32>
    %19 = arith.select %9, %18, %17 : vector<8x8xi1>, vector<8x8xf32>
    %cst_10 = arith.constant dense<0xFF800000> : vector<8xf32>
    %20 = vector.multi_reduction <maximumf>, %19, %cst_10 [1] : vector<8x8xf32> to vector<8xf32>
    %21 = vector.shape_cast %20 : vector<8xf32> to vector<8x1xf32>
    %22 = vector.broadcast %21 : vector<8x1xf32> to vector<8x8xf32>
    %23 = arith.subf %19, %22 : vector<8x8xf32>
    %24 = math.exp %23 : vector<8x8xf32>
    %cst_11 = arith.constant dense<0.000000e+00> : vector<8xf32>
    %25 = vector.multi_reduction <add>, %24, %cst_11 [1] : vector<8x8xf32> to vector<8xf32>
    %26 = vector.shape_cast %25 : vector<8xf32> to vector<8x1xf32>
    %27 = tpu.reciprocal %26 {approx = true} : vector<8x1xf32> -> vector<8x1xf32>
    %28 = vector.broadcast %27 : vector<8x1xf32> to vector<8x8xf32>
    %29 = arith.mulf %24, %28 : vector<8x8xf32>
    %cst_12 = arith.constant dense<0.000000e+00> : vector<8x128xf32>
    %30 = tpu.matmul %29, %16, %cst_12 {dimension_numbers = #tpu.dot_dimension_numbers<[0], [0], [1], [1], [0, 1, 1, 1], [], []>} : vector<8x8xf32>, vector<8x128xf32>, vector<8x128xf32> -> vector<8x128xf32>
    %31 = arith.index_cast %11 : i32 to index
    %c0_13 = arith.constant 0 : index
    %32 = vector.load %arg4[%31, %c0_13] : memref<8x128xf32, #tpu.memory_space<vmem>>, vector<8x128xf32>
    tpu.vector_store %arg4[%31, %c0_13], %30 {strides = array<i32>} : memref<8x128xf32, #tpu.memory_space<vmem>>, vector<8x128xf32>,
    %c1_i32 = arith.constant 1 : i32
    return
  }
  func.func @transform_0(%arg0: i32) -> (i32, i32) {
    %c0_i32 = arith.constant 0 : i32
    %c0_i32_0 = arith.constant 0 : i32
    return %arg0, %c0_i32 : i32, i32
  }
  func.func @transform_1(%arg0: i32) -> (i32, i32) {
    %c0_i32 = arith.constant 0 : i32
    %c0_i32_0 = arith.constant 0 : i32
    %c0_i32_1 = arith.constant 0 : i32
    return %c0_i32, %c0_i32_0 : i32, i32
  }
  func.func @transform_2(%arg0: i32) -> (i32, i32) {
    %c0_i32 = arith.constant 0 : i32
    %c0_i32_0 = arith.constant 0 : i32
    %c0_i32_1 = arith.constant 0 : i32
    return %c0_i32, %c0_i32_0 : i32, i32
  }
  func.func @transform_3(%arg0: i32) -> (i32, i32) {
    %c0_i32 = arith.constant 0 : i32
    %c0_i32_0 = arith.constant 0 : i32
    return %arg0, %c0_i32 : i32, i32
  }
}

</mosaic_0001>

<bundles_post_ra>
// kernel: tpu_custom_call.1
= control target key start
LH: loop header
LB: loop body
LE: loop exit
PB: predicated region body
PF: predicated region fallthrough
CT: control target
= control target key end

     0   :  { %8 = vsyncpa [#allocation4], 0  ;;  %s1072_s0 = inlined_call_operand.hbm [shape: f32[16,32], index: 0, kind: input, shape index: {}]   ;;  %s1073_s1 = inlined_call_operand.hbm [shape: f32[32,256], index: 1, kind: input, shape index: {}]   ;;  %s1074_s2 = inlined_call_operand.vmem [shape: f32[1,256], index: 2, kind: input, shape index: {}]   ;;  %s1075_s3 = inlined_call_operand.hbm [shape: f32[16,128], index: 3, kind: output, shape index: {}]  }
   0x1   :  { %10 = vsyncpa [#allocation4 + $0x1], 0 }
   0x2   :  { %11 = vsyncpa [#allocation7], 0 }
   0x3   :  { %12 = vsyncpa [#allocation5], 0 }
   0x4   :  { %14 = vsyncpa [#allocation5 + $0x1], 0  ;;  %s864_s12 = smov 0   ;;  %s866_s13 = smov 0  }
   0x5   :  { %s868_s14 = smov 0   ;;  %s870_s15 = smov 0  }
   0x6 LB: > { %s885_s16 = sadd.s32 4294967295, %s834_s15   ;;  %s600_s17 = sadd.s32 4294967294, %s834_s15   ;;  %s834_s15 = sphi %s870_s15, %s1095_s15   ;;  %s830_s14 = sphi %s868_s14, %s1094_s14   ;;  %s826_s13 = sphi %s866_s13, %s1093_s13   ;;  %s822_s12 = sphi %s864_s12, %s1092_s12  }
   0x7   : > { %p40_p0 = scmp.ne.s32.totalorder %s826_s13, %s822_s12  ;;  %p1076_p1 = scmp.eq.s32.totalorder %s885_s16, 0 }
   0x8   : > { %p112_p3 = scmp.eq.s32.totalorder %s600_s17, 1  ;;  %p601_p5 = scmp.ge.s32.totalorder %s834_s15, 1 }
   0x9   : > { %p894_p4 = por %p1076_p1, %p40_p0  ;;  %p119_p7 = scmp.lt.s32.totalorder %s834_s15, 3 }
   0xa   : > { %p899_p6 = por %p112_p3, %p40_p0  ;;  %s836_s21 = smov [#allocation6]  }
   0xb   : > { %s1079_s18 = scalar_select %p894_p4, 1, 0 }
   0xc   : > { %s1080_s19 = scalar_select %p899_p6, 1, 0 }
   0xd   : > { %p904_p8 = pnand %p601_p5, %p119_p7  ;;  %s131_s22 = sshll.u32 %s836_s21, 4  ;;  %s908_s22 = int_to_ptr.vmem [resolvable:$true] %s131_s22 }
   0xe   : > { %s920_s24 = sadd.s32 1, %s834_s15   ;;  %s27_s25 = sadd.s32 1, %s830_s14 }
   0xf   : > { %s1081_s20 = scalar_select %p904_p8, 1, 0 }
  0x10   : > { %p648_p9 = pneg %p904_p8  ;;  %s24_s26 = ssub.s32 %s834_s15, %s920_s24 }
  0x11   : > { %s706_s29 = scalar_lea.hbm %s1073_s1, 1024 }
  0x12   : > { %p915_p11 = pnand %p648_p9, %p1076_p1  ;;  %p707_p12 = scmp.ne.s32.totalorder %s1073_s1, %s706_s29 }
  0x13   : > { %p713_p5 = scmp.lt.u32.totalorder %s706_s29, %s1073_s1 }
  0x14   : > { %p708_p13 = pneg %p915_p11 }
  0x16   : > { %p709_p0 = pnand %p708_p13, %p707_p12 }
  0x18   : > { %p710_p3 = pneg %p709_p0 }
  0x1a   : > { %p715_p7 = pnand %p713_p5, %p710_p3 }
  0x1c   : > { %718 = shalt.err (!%p715_p7)
}
  0x1d   : > { %s719_s7 = scalar_lea.vmem %s908_s22, 1024  ;;  %p727_p2 = scmp.lt.s32.totalorder %s908_s22, %s908_s22 }
  0x1e   : > { %p720_p9 = scmp.ne.s32.totalorder %s908_s22, %s719_s7  ;;  %p728_p6 = scmp.lt.s32.totalorder %s719_s7, %s719_s7 }
  0x20   : > { %p722_p10 = pnand %p720_p9, %p708_p13  ;;  %p729_p4 = por %p728_p6, %p727_p2 }
  0x22   : > { %p723_p1 = pneg %p722_p10 }
  0x24   : > { %p730_p8 = pnand %p729_p4, %p723_p1 }
  0x26   : > { %733 = shalt.err (!%p730_p8)
}
  0x27   : > { %s837_s8 = smov 256   ;;  %s838_s9 = smov 16  }
  0x28   : > { %651 = dma.hbm_to_vmem [thread:$0]  (!%p915_p11), %s1073_s1, 1024, %s908_s22, [#allocation7], %s837_s8, %s837_s8, %s838_s9  }
  0x29   : > { %p25_p2 = scmp.eq.s32.totalorder %s24_s26, 0  ;;  %p34_p1 = scmp.ne.s32.totalorder %s830_s14, %s826_s13 }
  0x2a   : > { %p35_p4 = scmp.eq.s32.totalorder %s834_s15, 0  ;;  %p661_p6 = scmp.lt.s32.totalorder %s834_s15, 2 }
  0x2b   : > { %s951_s17 = scalar_select %p25_p2, %s830_s14, %s27_s25  }
  0x2c   : > { %p36_p8 = por %p35_p4, %p34_p1  ;;  %p1083_p10 = scmp.eq.s32.totalorder %s885_s16, 1 }
  0x2d   : > { %s148_s27 = sand.u32 1, %s830_s14   ;;  %s605_s28 = sshll.u32 %s834_s15, 7 }
  0x2e   : > { %p955_p12 = por %p1083_p10, %p34_p1  ;;  %s604_s29 = sshll.u32 %s148_s27, 3 }
  0x2f   : > { %s964_s4 = scalar_lea.hbm %s1072_s0, %s605_s28  ;;  %s152_s22 = scalar_lea.vmem [#allocation3], %s604_s29 }
  0x30   : > { %s159_s25 = sshll.u32 %s152_s22, 4  ;;  %p966_p11 = pnand %p661_p6, %p36_p8  ;;  %s970_s25 = int_to_ptr.vmem [resolvable:$true] %s159_s25 }
  0x31   : > { %s149_s5 = scalar_lea.sflag [#allocation4], %s148_s27  ;;  %s734_s6 = scalar_lea.hbm %s964_s4, 128 }
  0x32   : > { %p735_p13 = scmp.ne.s32.totalorder %s964_s4, %s734_s6  ;;  %p736_p0 = pneg %p966_p11 }
  0x33   : > { %s739_s9 = scalar_lea.hbm %s1072_s0, 256  ;;  %p740_p7 = scmp.lt.u32.totalorder %s964_s4, %s1072_s0 }
  0x34   : > { %p737_p3 = pnand %p736_p0, %p735_p13  ;;  %p741_p9 = scmp.lt.u32.totalorder %s739_s9, %s734_s6 }
  0x35   : > { %p743_p1 = scmp.lt.u32.totalorder %s734_s6, %s964_s4 }
  0x36   : > { %p738_p5 = pneg %p737_p3  ;;  %p742_p2 = por %p741_p9, %p740_p7 }
  0x38   : > { %p744_p4 = por %p743_p1, %p742_p2 }
  0x3a   : > { %p745_p6 = pnand %p744_p4, %p738_p5 }
  0x3c   : > { %748 = shalt.err (!%p745_p6)
}
  0x3d   : > { %s749_s27 = scalar_lea.vmem %s970_s25, 128  ;;  %s839_s28 = smov [#allocation3]  }
  0x3e   : > { %p750_p8 = scmp.ne.s32.totalorder %s970_s25, %s749_s27  ;;  %s754_s29 = sshll.u32 %s839_s28, 4  ;;  %s755_s29 = int_to_ptr.vmem [resolvable:$false] %s754_s29 }
  0x3f   : > { %s756_s23 = scalar_lea.vmem %s755_s29, 256  ;;  %p757_p3 = scmp.lt.s32.totalorder %s970_s25, %s755_s29 }
  0x40   : > { %p752_p10 = pnand %p750_p8, %p736_p0  ;;  %p758_p7 = scmp.lt.s32.totalorder %s756_s23, %s749_s27 }
  0x42   : > { %p753_p13 = pneg %p752_p10  ;;  %p759_p9 = por %p758_p7, %p757_p3 }
  0x44   : > { %p760_p2 = pnand %p759_p9, %p753_p13 }
  0x46   : > { %763 = shalt.err (!%p760_p2)
}
  0x47   : > { %655 = dma.hbm_to_vmem [thread:$0]  (!%p966_p11), %s964_s4, 128, %s970_s25, %s149_s5  }
  0x48   : > { %p1086_p5 = scmp.ne.s32.totalorder %s1081_s20, 0 }
  0x49   : > { %s1000_s30 = sand.u32 (!%p1086_p5), 1, %s826_s13   ;;  %p1087_p0 = scmp.ne.s32.totalorder (!%p1086_p5), %s1079_s18, 0 }
  0x4a   : > { %168 = sbr.rel (%p1086_p5) target bundleno = 1307 (0x51b), region = 32  ;;  %s607_s22 = sshll.u32 (!%p1086_p5), %s1000_s30, 3 }
  0x4b   : > { %s171_s6 = scalar_lea.sflag (!%p1086_p5), [#allocation4], %s1000_s30  ;;  %s174_s7 = scalar_lea.vmem (!%p1086_p5), [#allocation3], %s607_s22 }
  0x51   : > { %809 = dma.done.wait (%p1087_p0), %s171_s6, 128  }
  0x52   : > { %811 = vsyncadd (%p1087_p0), %s171_s6, 4294967168  ;;  %p1088_p11 = scmp.eq.s32.totalorder %s885_s16, 0 }
  0x54   : > { %813 = dma.done.wait (%p1088_p11), [#allocation7], 1024   ;;  %p1089_p1 = pmov %p1088_p11 }
  0x55   : > { %v840_v0 = vmov 0.0   ;;  %v203_v1 = vld [vmem:[#allocation6 + $0x8] sm:$0xff]  ;;  %v205_v2 = vld [vmem:[#allocation6 + $0x18] sm:$0xff]  ;;  %v202_v3 = vld [vmem:[#allocation6] sm:$0xff]  ;;  %vm222_vm0 = vcmask 261120   ;;  %vm841_vm1 = vmmov 0   ;;  %v212_v14 = vlaneseq }
  0x56   : > { %815 = vsyncadd (%p1089_p1), [#allocation7], 4294966272  ;;  %290 = vmatprep.mubr.f32.mxu0 %v840_v0  ;;  %622 = vmatprep.subr.mxu1 %v840_v0  ;;  %v632_v4 = vpack.c.bf16 %v205_v2, %v203_v1  ;;  %v204_v5 = vld [vmem:[#allocation6 + $0x10] sm:$0xff]  ;;  %v207_v6 = vld [vmem:[#allocation6 + $0x28] sm:$0xff]  ;;  %vm312_vm2 = vcmask 130048   ;;  %s842_s4 = smov 112  }
  0x57   : > { %v209_v7 = vld [vmem:[#allocation6 + $0x38] sm:$0xff]  ;;  %v634_v8 = vpack.c.bf16 %v204_v5, %v202_v3  ;;  %v206_v10 = vld [vmem:[#allocation6 + $0x20] sm:$0xff]  ;;  %v208_v11 = vld [vmem:[#allocation6 + $0x30] sm:$0xff]  ;;  %624 = vmatprep.mubr.msk.f32.mxu1 %vm841_vm1, %v840_v0  ;;  %v213_v15 = vshrl.u32 %v212_v14, 7  ;;  %v302_v26 = vand.u32 127, %v212_v14  ;;  %vm388_vm4 = vcmask 64512  }
  0x58   : > { %v636_v9 = vpack.c.bf16 %v209_v7, %v207_v6  ;;  %633 = vmatprep.subr.bf16.mxu0 %v632_v4  ;;  %v638_v12 = vpack.c.bf16 %v208_v11, %v206_v10  ;;  %v201_v13 = vld [vmem:[%s174_s7] sm:$0xff]  ;;  %s200_s25 = scalar_lea.vmem [#allocation8], %s607_s22  ;;  %s615_s5 = sshll.u32 %s885_s16, 7 }
  0x59   : > { %635 = vmatpush1.bf16.msra.mxu0 %v634_v8  ;;  %v214_v16 = vsub.s32 0, %v213_v15  ;;  %v210_v17 = vld [vmem:[%s1074_s2] sm:$0x3]  ;;  %v218_v22 = vsub.s32 1, %v213_v15  ;;  %vm303_vm3 = vcmp.gt.s32.totalorder %v213_v15, %v302_v26  ;;  %s520_s26 = sshll.u32 %s200_s25, 4  ;;  %s1030_s10 = scalar_lea.hbm %s1075_s3, %s615_s5  ;;  %s1025_s26 = int_to_ptr.vmem [resolvable:$true] %s520_s26 }
  0x5a   : > { %637 = vmatprep.subr.bf16.mxu0 %v636_v9  ;;  %s507_s11 = scalar_lea.sflag [#allocation5], %s1000_s30  ;;  %s764_s27 = scalar_lea.vmem %s1025_s26, 128 }
  0x5b   : > { %v215_v18 = vrot.slane %v210_v17, %v214_v16  ;;  %v219_v23 = vrot.slane %v210_v17, %v218_v22  ;;  %p765_p4 = scmp.ne.s32.totalorder %s1025_s26, %s764_s27  ;;  %s843_s16 = smov [#allocation8]  }
  0x5c   : > { %s768_s28 = sshll.u32 %s843_s16, 4  ;;  %s769_s28 = int_to_ptr.vmem [resolvable:$false] %s768_s28 }
  0x5d   : > { %639 = vmatpush1.bf16.msra.mxu0 %v638_v12  ;;  %p766_p6 = pnand %p765_p4, %p955_p12  ;;  %s770_s29 = scalar_lea.vmem %s769_s28, 256 }
  0x5e   : > { %p771_p10 = scmp.lt.s32.totalorder %s1025_s26, %s769_s28  ;;  %p772_p13 = scmp.lt.s32.totalorder %s770_s29, %s764_s27 }
  0x5f   : > { %p767_p8 = pneg %p766_p6 }
  0x60   : > { %610 = vmatmul.mubr.msk.f32.vlgmr.msra.gmra.mrb[0].mxu0 %vm222_vm0, %v201_v13  ;;  %p773_p3 = por %p772_p13, %p771_p10 }
  0x62   : > { %p774_p7 = pnand %p773_p3, %p767_p8 }
 0x133   : > { %v292_v19 = vpop.f32.mrb[0].mxu0 }
 0x134   : > { %v293_v20 = vadd.f32 %v292_v19, %v215_v18  ;;  %v294_v21 = vpop.f32.mrb[1].mxu0 }
 0x135   : > { %v295_v24 = vadd.f32 %v294_v21, %v219_v23 }
 0x136   : > { %310 = vrot.lane.b32.xlu0 %v293_v20, %s842_s4  ;;  %623 = vmatpush3.xpose.msk.msra.mxu1 %vm312_vm2, %v293_v20 }
 0x137   : > { %627 = vmatprep.subr.mxu1 %v840_v0 }
 0x1a8   : > { %v311_v25 = vpop.permute.xlu0 %310 }
 0x1a9   : > { %625 = vmatmul.mubr.msk.f32.vlgmr.msra.gmra.mrb[0].mxu1 %vm312_vm2, %v311_v25 }
 0x1aa   : > { %628 = vmatpush3.msra.mxu1 %v295_v24  ;;  %629 = vmatprep.mubr.msk.f32.mxu1 %vm841_vm1, %v840_v0 }
 0x27c   : > { %v383_v27 = vpop.f32.mrb[0].mxu1 }
 0x27d   : > { %v387_v28 = vsel %vm303_vm3, -inf, %v383_v27  ;;  %v626_v29 = vpop.f32.mrb[1].mxu1 }
 0x27e   : > { %v389_v30 = vsel %vm388_vm4, %v387_v28, -inf }
 0x27f   : > { %390 = vmax.xlane.f32.xlu0 %v389_v30 }
 0x30c   : > { %v391_v31 = vpop.xlane.xlu0 %390 }
 0x30d   : > { %v392_v32 = vsub.f32 %v387_v28, %v391_v31 }
 0x30f   : > { %v393_v33 = vmul.f32 1.442695, %v392_v32 }
 0x311   : > { %702 = vpow2.f32 %v393_v33 }
 0x31b   : > { %v703_v34 = vpop.eup %702 }
 0x31c   : > { %v395_v35 = vsel %vm388_vm4, %v703_v34, 0.0 }
 0x31d   : > { %396 = vadd.xlane.f32.xlu1 %v395_v35 }
 0x3aa   : > { %v397_v36 = vpop.xlane.xlu1 %396 }
 0x3ab   : > { %704 = vrcp.f32 %v397_v36 }
 0x3b5   : > { %v705_v37 = vpop.eup %704 }
 0x3b6   : > { %v399_v38 = vmul.f32 %v705_v37, %v703_v34 }
 0x3b8   : > { %400 = vxpose.xlu1.b32.start.end [1/1] (short) (narrow) %v399_v38, 8 }
 0x438   : > { %v416_v39 = vpop.trf.xlu1 }
 0x439   : > { %630 = vmatmul.mubr.msk.f32.vlgmr.msra.gmra.mrb[2].mxu1 %vm388_vm4, %v416_v39 }
 0x50c   : > { %v501_v40 = vpop.f32.mrb[2].mxu1 }
 0x50d   : > { %505 = vst [vmem:[%s200_s25] sm:$0xff] %v501_v40  ;;  %v631_v41 = vpop.f32.mrb[3].mxu1 }
 0x50e   : > { %777 = shalt.err (!%p774_p7)
}
 0x50f   : > { %s778_s23 = scalar_lea.hbm %s1030_s10, 128  ;;  %s782_s6 = scalar_lea.hbm %s1075_s3, 256 }
 0x510   : > { %p779_p9 = scmp.ne.s32.totalorder %s1030_s10, %s778_s23  ;;  %p783_p0 = scmp.lt.u32.totalorder %s1030_s10, %s1075_s3 }
 0x511   : > { %p784_p11 = scmp.lt.u32.totalorder %s782_s6, %s778_s23  ;;  %p786_p4 = scmp.lt.u32.totalorder %s778_s23, %s1030_s10 }
 0x512   : > { %p780_p2 = pnand %p779_p9, %p955_p12 }
 0x513   : > { %p785_p1 = por %p784_p11, %p783_p0 }
 0x514   : > { %p781_p5 = pneg %p780_p2 }
 0x515   : > { %p787_p6 = por %p786_p4, %p785_p1 }
 0x517   : > { %p788_p8 = pnand %p787_p6, %p781_p5 }
 0x519   : > { %791 = shalt.err (!%p788_p8)
}
 0x51a   : > { %646 = dma.vmem_to_hbm [thread:$0]  (%p955_p12), %s1025_s26, 128, %s1030_s10, %s507_s11  }
 0x51b PF: > { %s532_s20 = sand.u32 1, %s822_s12   ;;  %p1090_p10 = scmp.ne.s32.totalorder %s1080_s19, 0 }
 0x51c   : > { %p1091_p13 = scmp.ge.s32.totalorder %s834_s15, 2  ;;  %s533_s4 = scalar_lea.sflag [#allocation5], %s532_s20 }
 0x51e   : > { %p657_p3 = pnand %p1091_p13, %p1090_p10 }
 0x520   : > { %817 = dma.done.wait (!%p657_p3), %s533_s4, 128  }
 0x521   : > { %819 = vsyncadd (!%p657_p3), %s533_s4, 4294967168  ;;  %p17_p7 = scmp.ge.s32.totalorder %s920_s24, 4   ;;  %s1092_s12 = smov %s826_s13 }
 0x522   : > { %s1093_s13 = smov %s830_s14  ;;  %s1094_s14 = smov %s951_s17 }
 0x523   : > { %s1095_s15 = smov %s920_s24  ;;  %19 = sbr.rel (!%p17_p7) target bundleno = 6 (0x6), region = 82 }
 0x52a   :  { %538 = vsyncpa [#allocation4], 1 }
 0x52b   :  { %540 = vsyncpa [#allocation4 + $0x1], 1 }
 0x52c   :  { %541 = vsyncpa [#allocation7], 1 }
 0x52d   :  { %542 = vsyncpa [#allocation5], 1 }
 0x52e   :  { %544 = vsyncpa [#allocation5 + $0x1], 1 }

</bundles_post_ra>
